<compile_context>
chip_gen: v7x
topology: tpu7x:2x2x1
jax: 0.10.0
libtpu: 0.0.40
codegen_flags: <defaults>
</compile_context>

<pallas_src>
import functools

import jax
import jax.numpy as jnp
from jax.experimental import pallas as pl
from jax.experimental.pallas import tpu as pltpu


# --------------------------------------------------------------------------
# Fused path: all stage weights resident (single-buffered) in VMEM.
# --------------------------------------------------------------------------
def _fused_kernel(x_ref, w_ref, b_ref, o_ref, *, num_stages):
    # Carry the inter-stage activation in bf16 (MXU-native LHS); accumulate in
    # f32 on the MXU and do bias + GELU in f32.
    h = x_ref[...].astype(jnp.bfloat16)

    def stage(s, h):
        y = jnp.dot(h, w_ref[s], preferred_element_type=jnp.float32)
        # TODO(synk): confirm the reference module uses tanh-approx GELU
        # (nn.GELU(approximate='tanh')); exact-erf GELU differs slightly.
        y = jax.nn.gelu(y + b_ref[s], approximate=True)
        return y.astype(jnp.bfloat16)

    h = jax.lax.fori_loop(0, num_stages, stage, h, unroll=True)
    o_ref[...] = h.astype(o_ref.dtype)


# --------------------------------------------------------------------------
# Grouped / staged path: grid = (M tiles, stage groups).  The running
# activation lives in a bf16 VMEM scratch; f32 output written only at the
# last group.
# --------------------------------------------------------------------------
def _grouped_kernel(x_ref, w_ref, b_ref, o_ref, h_ref, *, group_size):
    g = pl.program_id(1)

    @pl.when(g == 0)
    def _():
        h_ref[...] = x_ref[...].astype(h_ref.dtype)

    h = h_ref[...]
    y = None
    for s in range(group_size):               # static indices into (G, H, H)
        y = jnp.dot(h, w_ref[s], preferred_element_type=jnp.float32)
        y = jax.nn.gelu(y + b_ref[s], approximate=True)
        h = y.astype(h_ref.dtype)
    h_ref[...] = h

    @pl.when(g == pl.num_programs(1) - 1)
    def _():
        o_ref[...] = y.astype(o_ref.dtype)    # last stage result, still f32


# --------------------------------------------------------------------------
# Helpers
# --------------------------------------------------------------------------
def _vmem_capacity_bytes():
    try:
        return int(pltpu.get_tpu_info().vmem_capacity_bytes)
    except Exception:
        return 64 * 1024 * 1024   # conservative: v7x per-TensorCore VMEM


def _pick_tm(M, max_tm):
    """Largest power-of-two row tile <= max_tm that still keeps >= 2 M-tiles
    (megacore sharding on v7x + >= 2 pipeline steps), floor of 8 rows."""
    max_tm = int(max(8, min(max_tm, 2048)))
    tm = 8
    while tm * 2 <= max_tm and tm * 2 < M:
        tm *= 2
    return tm


def _largest_group(num_stages, H, budget_bytes):
    """Largest proper divisor G of num_stages whose double-buffered bf16
    weight+bias group fits the budget (falls back to 1)."""
    for g in range(num_stages - 1, 0, -1):
        if num_stages % g != 0:
            continue
        if 2 * (g * H * H * 2 + g * H * 4) <= budget_bytes:
            return g
    return 1


def local_pipeline(x, weights, biases, *, fused_weight_budget_bytes=None):
    """x: [M, H] f32; weights: [S, H, H] f32 (pre-transposed); biases: [S, 1, H] f32."""
    num_stages, H, H_out = weights.shape
    assert H == H_out, "pipeline stages are Linear(hidden, hidden)"
    M = x.shape[0]

    # MXU is bf16-native; keep f32 accumulation + f32 bias/GELU.
    w_bf16 = weights.astype(jnp.bfloat16)
    b_f32 = biases.astype(jnp.float32)

    vmem_cap = _vmem_capacity_bytes()
    vmem_limit = int(vmem_cap * 0.75)      # ~96 MiB on v5e/v6e, ~48 MiB on v7x
    auto_budget = int(vmem_cap * 0.40)     # ~51 MiB on v5e/v6e, ~25 MiB on v7x
    fused_budget = (auto_budget if fused_weight_budget_bytes is None
                    else fused_weight_budget_bytes)

    weight_bytes = num_stages * H * H * 2  # bf16 (single-buffered in fused path)
    bias_bytes = num_stages * H * 4
    margin = 4 * 1024 * 1024

    fused = (weight_bytes + bias_bytes) <= fused_budget

    if fused:
        max_tm = (vmem_limit - weight_bytes - bias_bytes - margin) // (32 * H)
        tm = _pick_tm(M, max_tm)
    else:
        # Stage-group size chosen from the generation-aware budget (not the
        # possibly-overridden fused budget) so it stays VMEM-safe.
        G = _largest_group(num_stages, H, auto_budget)
        group_bytes = 2 * (G * H * H * 2 + G * H * 4)   # double-buffered group
        max_tm = (vmem_limit - group_bytes - margin) // (40 * H)
        tm = _pick_tm(M, max_tm)

    num_m_tiles = pl.cdiv(M, tm)
    padded_M = num_m_tiles * tm
    x_in = x if padded_M == M else jnp.pad(x, ((0, padded_M - M), (0, 0)))

    out_shape = jax.ShapeDtypeStruct((padded_M, H), jnp.float32)
    flops = 2 * padded_M * H * H * num_stages
    transcendentals = padded_M * H * num_stages

    if fused:
        kernel = functools.partial(_fused_kernel, num_stages=num_stages)
        cost = pl.CostEstimate(
            flops=int(flops),
            transcendentals=int(transcendentals),
            bytes_accessed=int(8 * padded_M * H + weight_bytes + bias_bytes))

        def build(single_buffer_weights):
            # Grid-invariant weight/bias blocks: single-buffer them so the
            # default double-buffering doesn't duplicate them in VMEM.
            kw = ({"pipeline_mode": pl.Buffered(1)}
                  if single_buffer_weights else {})
            grid_spec = pltpu.PrefetchScalarGridSpec(
                num_scalar_prefetch=0,
                grid=(num_m_tiles,),
                in_specs=[
                    pl.BlockSpec((tm, H), lambda i: (i, 0)),                   # x tile
                    pl.BlockSpec((num_stages, H, H), lambda i: (0, 0, 0), **kw),  # all W
                    pl.BlockSpec((num_stages, 1, H), lambda i: (0, 0, 0), **kw),  # all b
                ],
                out_specs=pl.BlockSpec((tm, H), lambda i: (i, 0)),
            )
            return pl.pallas_call(
                kernel,
                out_shape=out_shape,
                grid_spec=grid_spec,
                compiler_params=pltpu.CompilerParams(
                    dimension_semantics=("parallel",),
                    vmem_limit_bytes=vmem_limit),
                cost_estimate=cost,
            )

        try:
            out = build(True)(x_in, w_bf16, b_f32)
        except Exception:
            # Fallback if this Pallas build rejects single-buffered blocks;
            # identical semantics, just default double-buffering.
            out = build(False)(x_in, w_bf16, b_f32)
    else:
        num_groups = num_stages // G
        kernel = functools.partial(_grouped_kernel, group_size=G)
        cost = pl.CostEstimate(
            flops=int(flops),
            transcendentals=int(transcendentals),
            bytes_accessed=int(8 * padded_M * H
                               + num_m_tiles * (weight_bytes + bias_bytes)))
        grid_spec = pltpu.PrefetchScalarGridSpec(
            num_scalar_prefetch=0,
            grid=(num_m_tiles, num_groups),
            in_specs=[
                pl.BlockSpec((tm, H), lambda i, g: (i, 0)),        # x tile
                pl.BlockSpec((G, H, H), lambda i, g: (g, 0, 0)),   # W group
                pl.BlockSpec((G, 1, H), lambda i, g: (g, 0, 0)),   # b group
            ],
            out_specs=pl.BlockSpec((tm, H), lambda i, g: (i, 0)),
            scratch_shapes=[pltpu.VMEM((tm, H), jnp.bfloat16)],    # running act
        )
        out = pl.pallas_call(
            kernel,
            out_shape=out_shape,
            grid_spec=grid_spec,
            compiler_params=pltpu.CompilerParams(
                dimension_semantics=("parallel", "arbitrary"),
                vmem_limit_bytes=vmem_limit),
            cost_estimate=cost,
        )(x_in, w_bf16, b_f32)

    return out if padded_M == M else out[:M]


def reference_pipeline(x, weights, biases):
    h = x
    for s in range(weights.shape[0]):
        h = jax.nn.gelu(h @ weights[s] + biases[s, 0], approximate=True)
    return h


if __name__ == "__main__":
    # Small BERT-like shapes: batch=2, seq_len=8, hidden=128, 3 pipeline stages.
    batch, seq_len, hidden, num_stages = 2, 8, 128, 3
    M = batch * seq_len

    key = jax.random.PRNGKey(0)
    kx, kw, kb = jax.random.split(key, 3)

    x = jax.random.normal(kx, (batch, seq_len, hidden), dtype=jnp.float32)
    weights = 0.02 * jax.random.normal(
        kw, (num_stages, hidden, hidden), dtype=jnp.float32)
    biases = 0.01 * jax.random.normal(
        kb, (num_stages, 1, hidden), dtype=jnp.float32)

    x2d = x.reshape(M, hidden)
    ref = reference_pipeline(x2d, weights, biases)

    # Fused (small-shape) path.
    out_fused = jax.block_until_ready(local_pipeline(x2d, weights, biases))
    assert out_fused.shape == (M, hidden)
    assert jnp.allclose(out_fused, ref, atol=3e-2, rtol=3e-2), \
        "fused path mismatch vs reference"

    # Grouped/staged path (forced by zero fused-weight budget) — exercises the
    # per-group streaming kernel, the bf16 activation scratch, and the
    # final-group-only output write as well.
    out_staged = jax.block_until_ready(
        local_pipeline(x2d, weights, biases, fused_weight_budget_bytes=0))
    assert out_staged.shape == (M, hidden)
    assert jnp.allclose(out_staged, ref, atol=3e-2, rtol=3e-2), \
        "staged path mismatch vs reference"

    # TODO(synk): the .cpu()/.to(device) transfers and RRef parameter plumbing
    # of the original module are distributed-runtime glue with no Pallas
    # equivalent on a single TPU.
    print("KERNEL_OK")
</pallas_src>

<mosaic_0001>
module attributes {stable_mosaic.version = 11 : i64} {
  func.func @_fused_kernel(%arg0: i32, %arg1: memref<8x128xf32, #tpu.memory_space<vmem>>, %arg2: memref<3x128x128xbf16, #tpu.memory_space<vmem>>, %arg3: memref<3x1x128xf32, #tpu.memory_space<vmem>>, %arg4: memref<8x128xf32, #tpu.memory_space<vmem>>) attributes {dimension_semantics = [#tpu.dimension_semantics<parallel>], iteration_bounds = array<i64: 2>, scalar_prefetch = 0 : i64, scratch_operands = 0 : i64, tpu.core_type = #tpu.core_type<tc>, window_params = [{transform_indices = @transform_0, window_bounds = array<i64: 8, 128>}, {pipeline_mode = #tpu.pipeline_mode<synchronous>, transform_indices = @transform_1, window_bounds = array<i64: 3, 128, 128>}, {pipeline_mode = #tpu.pipeline_mode<synchronous>, transform_indices = @transform_2, window_bounds = array<i64: 3, 1, 128>}, {transform_indices = @transform_3, window_bounds = array<i64: 8, 128>}]} {
    %c0 = arith.constant 0 : index
    %c0_0 = arith.constant 0 : index
    %0 = vector.load %arg1[%c0, %c0_0] : memref<8x128xf32, #tpu.memory_space<vmem>>, vector<8x128xf32>
    %1 = arith.truncf %0 : vector<8x128xf32> to vector<8x128xbf16>
    %c0_i32 = arith.constant 0 : i32
    %2 = arith.index_cast %c0_i32 : i32 to index
    %c0_1 = arith.constant 0 : index
    %c0_2 = arith.constant 0 : index
    %3 = vector.load %arg2[%2, %c0_1, %c0_2] : memref<3x128x128xbf16, #tpu.memory_space<vmem>>, vector<1x128x128xbf16>
    %4 = vector.shape_cast %3 : vector<1x128x128xbf16> to vector<128x128xbf16>
    %cst = arith.constant dense<0.000000e+00> : vector<8x128xf32>
    %5 = tpu.matmul %1, %4, %cst {dimension_numbers = #tpu.dot_dimension_numbers<[1], [0], [0], [1], [0, 0, 1, 1], [], []>} : vector<8x128xbf16>, vector<128x128xbf16>, vector<8x128xf32> -> vector<8x128xf32>
    %6 = arith.index_cast %c0_i32 : i32 to index
    %c0_3 = arith.constant 0 : index
    %c0_4 = arith.constant 0 : index
    %7 = vector.load %arg3[%6, %c0_3, %c0_4] : memref<3x1x128xf32, #tpu.memory_space<vmem>>, vector<1x1x128xf32>
    %8 = vector.shape_cast %7 : vector<1x1x128xf32> to vector<1x128xf32>
    %9 = vector.broadcast %8 : vector<1x128xf32> to vector<8x128xf32>
    %10 = arith.addf %5, %9 : vector<8x128xf32>
    %11 = arith.mulf %10, %10 : vector<8x128xf32>
    %12 = arith.mulf %10, %11 : vector<8x128xf32>
    %cst_5 = arith.constant 4.471500e-02 : f32
    %13 = vector.broadcast %cst_5 : f32 to vector<8x128xf32>
    %14 = arith.mulf %13, %12 : vector<8x128xf32>
    %15 = arith.addf %10, %14 : vector<8x128xf32>
    %cst_6 = arith.constant 0.797884583 : f32
    %16 = vector.broadcast %cst_6 : f32 to vector<8x128xf32>
    %17 = arith.mulf %16, %15 : vector<8x128xf32>
    %18 = math.tanh %17 : vector<8x128xf32>
    %cst_7 = arith.constant 1.000000e+00 : f32
    %19 = vector.broadcast %cst_7 : f32 to vector<8x128xf32>
    %20 = arith.addf %19, %18 : vector<8x128xf32>
    %cst_8 = arith.constant 5.000000e-01 : f32
    %21 = vector.broadcast %cst_8 : f32 to vector<8x128xf32>
    %22 = arith.mulf %21, %20 : vector<8x128xf32>
    %23 = arith.mulf %10, %22 : vector<8x128xf32>
    %24 = arith.truncf %23 : vector<8x128xf32> to vector<8x128xbf16>
    %c1_i32 = arith.constant 1 : i32
    %25 = arith.index_cast %c1_i32 : i32 to index
    %c0_9 = arith.constant 0 : index
    %c0_10 = arith.constant 0 : index
    %26 = vector.load %arg2[%25, %c0_9, %c0_10] : memref<3x128x128xbf16, #tpu.memory_space<vmem>>, vector<1x128x128xbf16>
    %27 = vector.shape_cast %26 : vector<1x128x128xbf16> to vector<128x128xbf16>
    %cst_11 = arith.constant dense<0.000000e+00> : vector<8x128xf32>
    %28 = tpu.matmul %24, %27, %cst_11 {dimension_numbers = #tpu.dot_dimension_numbers<[1], [0], [0], [1], [0, 0, 1, 1], [], []>} : vector<8x128xbf16>, vector<128x128xbf16>, vector<8x128xf32> -> vector<8x128xf32>
    %29 = arith.index_cast %c1_i32 : i32 to index
    %c0_12 = arith.constant 0 : index
    %c0_13 = arith.constant 0 : index
    %30 = vector.load %arg3[%29, %c0_12, %c0_13] : memref<3x1x128xf32, #tpu.memory_space<vmem>>, vector<1x1x128xf32>
    %31 = vector.shape_cast %30 : vector<1x1x128xf32> to vector<1x128xf32>
    %32 = vector.broadcast %31 : vector<1x128xf32> to vector<8x128xf32>
    %33 = arith.addf %28, %32 : vector<8x128xf32>
    %34 = arith.mulf %33, %33 : vector<8x128xf32>
    %35 = arith.mulf %33, %34 : vector<8x128xf32>
    %cst_14 = arith.constant 4.471500e-02 : f32
    %36 = vector.broadcast %cst_14 : f32 to vector<8x128xf32>
    %37 = arith.mulf %36, %35 : vector<8x128xf32>
    %38 = arith.addf %33, %37 : vector<8x128xf32>
    %cst_15 = arith.constant 0.797884583 : f32
    %39 = vector.broadcast %cst_15 : f32 to vector<8x128xf32>
    %40 = arith.mulf %39, %38 : vector<8x128xf32>
    %41 = math.tanh %40 : vector<8x128xf32>
    %cst_16 = arith.constant 1.000000e+00 : f32
    %42 = vector.broadcast %cst_16 : f32 to vector<8x128xf32>
    %43 = arith.addf %42, %41 : vector<8x128xf32>
    %cst_17 = arith.constant 5.000000e-01 : f32
    %44 = vector.broadcast %cst_17 : f32 to vector<8x128xf32>
    %45 = arith.mulf %44, %43 : vector<8x128xf32>
    %46 = arith.mulf %33, %45 : vector<8x128xf32>
    %47 = arith.truncf %46 : vector<8x128xf32> to vector<8x128xbf16>
    %c2_i32 = arith.constant 2 : i32
    %48 = arith.index_cast %c2_i32 : i32 to index
    %c0_18 = arith.constant 0 : index
    %c0_19 = arith.constant 0 : index
    %49 = vector.load %arg2[%48, %c0_18, %c0_19] : memref<3x128x128xbf16, #tpu.memory_space<vmem>>, vector<1x128x128xbf16>
    %50 = vector.shape_cast %49 : vector<1x128x128xbf16> to vector<128x128xbf16>
    %cst_20 = arith.constant dense<0.000000e+00> : vector<8x128xf32>
    %51 = tpu.matmul %47, %50, %cst_20 {dimension_numbers = #tpu.dot_dimension_numbers<[1], [0], [0], [1], [0, 0, 1, 1], [], []>} : vector<8x128xbf16>, vector<128x128xbf16>, vector<8x128xf32> -> vector<8x128xf32>
    %52 = arith.index_cast %c2_i32 : i32 to index
    %c0_21 = arith.constant 0 : index
    %c0_22 = arith.constant 0 : index
    %53 = vector.load %arg3[%52, %c0_21, %c0_22] : memref<3x1x128xf32, #tpu.memory_space<vmem>>, vector<1x1x128xf32>
    %54 = vector.shape_cast %53 : vector<1x1x128xf32> to vector<1x128xf32>
    %55 = vector.broadcast %54 : vector<1x128xf32> to vector<8x128xf32>
    %56 = arith.addf %51, %55 : vector<8x128xf32>
    %57 = arith.mulf %56, %56 : vector<8x128xf32>
    %58 = arith.mulf %56, %57 : vector<8x128xf32>
    %cst_23 = arith.constant 4.471500e-02 : f32
    %59 = vector.broadcast %cst_23 : f32 to vector<8x128xf32>
    %60 = arith.mulf %59, %58 : vector<8x128xf32>
    %61 = arith.addf %56, %60 : vector<8x128xf32>
    %cst_24 = arith.constant 0.797884583 : f32
    %62 = vector.broadcast %cst_24 : f32 to vector<8x128xf32>
    %63 = arith.mulf %62, %61 : vector<8x128xf32>
    %64 = math.tanh %63 : vector<8x128xf32>
    %cst_25 = arith.constant 1.000000e+00 : f32
    %65 = vector.broadcast %cst_25 : f32 to vector<8x128xf32>
    %66 = arith.addf %65, %64 : vector<8x128xf32>
    %cst_26 = arith.constant 5.000000e-01 : f32
    %67 = vector.broadcast %cst_26 : f32 to vector<8x128xf32>
    %68 = arith.mulf %67, %66 : vector<8x128xf32>
    %69 = arith.mulf %56, %68 : vector<8x128xf32>
    %70 = arith.truncf %69 : vector<8x128xf32> to vector<8x128xbf16>
    %c3_i32 = arith.constant 3 : i32
    %71 = arith.extf %70 : vector<8x128xbf16> to vector<8x128xf32>
    %c0_27 = arith.constant 0 : index
    %c0_28 = arith.constant 0 : index
    %72 = vector.load %arg4[%c0_27, %c0_28] : memref<8x128xf32, #tpu.memory_space<vmem>>, vector<8x128xf32>
    tpu.vector_store %arg4[%c0_27, %c0_28], %71 {strides = array<i32>} : memref<8x128xf32, #tpu.memory_space<vmem>>, vector<8x128xf32>,
    return
  }
  func.func @transform_0(%arg0: i32) -> (i32, i32) {
    %c0_i32 = arith.constant 0 : i32
    %c0_i32_0 = arith.constant 0 : i32
    return %arg0, %c0_i32 : i32, i32
  }
  func.func @transform_1(%arg0: i32) -> (i32, i32, i32) {
    %c0_i32 = arith.constant 0 : i32
    %c0_i32_0 = arith.constant 0 : i32
    %c0_i32_1 = arith.constant 0 : i32
    %c0_i32_2 = arith.constant 0 : i32
    return %c0_i32, %c0_i32_0, %c0_i32_1 : i32, i32, i32
  }
  func.func @transform_2(%arg0: i32) -> (i32, i32, i32) {
    %c0_i32 = arith.constant 0 : i32
    %c0_i32_0 = arith.constant 0 : i32
    %c0_i32_1 = arith.constant 0 : i32
    %c0_i32_2 = arith.constant 0 : i32
    return %c0_i32, %c0_i32_0, %c0_i32_1 : i32, i32, i32
  }
  func.func @transform_3(%arg0: i32) -> (i32, i32) {
    %c0_i32 = arith.constant 0 : i32
    %c0_i32_0 = arith.constant 0 : i32
    return %arg0, %c0_i32 : i32, i32
  }
}

module attributes {stable_mosaic.version = 11 : i64} {
  func.func @_fused_kernel(%arg0: i32, %arg1: memref<8x128xf32, #tpu.memory_space<vmem>>, %arg2: memref<3x128x128xbf16, #tpu.memory_space<vmem>>, %arg3: memref<3x1x128xf32, #tpu.memory_space<vmem>>, %arg4: memref<8x128xf32, #tpu.memory_space<vmem>>) attributes {dimension_semantics = [#tpu.dimension_semantics<parallel>], iteration_bounds = array<i64: 2>, scalar_prefetch = 0 : i64, scratch_operands = 0 : i64, tpu.core_type = #tpu.core_type<tc>, window_params = [{transform_indices = @transform_0, window_bounds = array<i64: 8, 128>}, {pipeline_mode = #tpu.pipeline_mode<synchronous>, transform_indices = @transform_1, window_bounds = array<i64: 3, 128, 128>}, {pipeline_mode = #tpu.pipeline_mode<synchronous>, transform_indices = @transform_2, window_bounds = array<i64: 3, 1, 128>}, {transform_indices = @transform_3, window_bounds = array<i64: 8, 128>}]} {
    %c0 = arith.constant 0 : index
    %c0_0 = arith.constant 0 : index
    %0 = vector.load %arg1[%c0, %c0_0] : memref<8x128xf32, #tpu.memory_space<vmem>>, vector<8x128xf32>
    %1 = arith.truncf %0 : vector<8x128xf32> to vector<8x128xbf16>
    %c0_i32 = arith.constant 0 : i32
    %2 = arith.index_cast %c0_i32 : i32 to index
    %c0_1 = arith.constant 0 : index
    %c0_2 = arith.constant 0 : index
    %3 = vector.load %arg2[%2, %c0_1, %c0_2] : memref<3x128x128xbf16, #tpu.memory_space<vmem>>, vector<1x128x128xbf16>
    %4 = vector.shape_cast %3 : vector<1x128x128xbf16> to vector<128x128xbf16>
    %cst = arith.constant dense<0.000000e+00> : vector<8x128xf32>
    %5 = tpu.matmul %1, %4, %cst {dimension_numbers = #tpu.dot_dimension_numbers<[1], [0], [0], [1], [0, 0, 1, 1], [], []>} : vector<8x128xbf16>, vector<128x128xbf16>, vector<8x128xf32> -> vector<8x128xf32>
    %6 = arith.index_cast %c0_i32 : i32 to index
    %c0_3 = arith.constant 0 : index
    %c0_4 = arith.constant 0 : index
    %7 = vector.load %arg3[%6, %c0_3, %c0_4] : memref<3x1x128xf32, #tpu.memory_space<vmem>>, vector<1x1x128xf32>
    %8 = vector.shape_cast %7 : vector<1x1x128xf32> to vector<1x128xf32>
    %9 = vector.broadcast %8 : vector<1x128xf32> to vector<8x128xf32>
    %10 = arith.addf %5, %9 : vector<8x128xf32>
    %11 = arith.mulf %10, %10 : vector<8x128xf32>
    %12 = arith.mulf %10, %11 : vector<8x128xf32>
    %cst_5 = arith.constant 4.471500e-02 : f32
    %13 = vector.broadcast %cst_5 : f32 to vector<8x128xf32>
    %14 = arith.mulf %13, %12 : vector<8x128xf32>
    %15 = arith.addf %10, %14 : vector<8x128xf32>
    %cst_6 = arith.constant 0.797884583 : f32
    %16 = vector.broadcast %cst_6 : f32 to vector<8x128xf32>
    %17 = arith.mulf %16, %15 : vector<8x128xf32>
    %18 = math.tanh %17 : vector<8x128xf32>
    %cst_7 = arith.constant 1.000000e+00 : f32
    %19 = vector.broadcast %cst_7 : f32 to vector<8x128xf32>
    %20 = arith.addf %19, %18 : vector<8x128xf32>
    %cst_8 = arith.constant 5.000000e-01 : f32
    %21 = vector.broadcast %cst_8 : f32 to vector<8x128xf32>
    %22 = arith.mulf %21, %20 : vector<8x128xf32>
    %23 = arith.mulf %10, %22 : vector<8x128xf32>
    %24 = arith.truncf %23 : vector<8x128xf32> to vector<8x128xbf16>
    %c1_i32 = arith.constant 1 : i32
    %25 = arith.index_cast %c1_i32 : i32 to index
    %c0_9 = arith.constant 0 : index
    %c0_10 = arith.constant 0 : index
    %26 = vector.load %arg2[%25, %c0_9, %c0_10] : memref<3x128x128xbf16, #tpu.memory_space<vmem>>, vector<1x128x128xbf16>
    %27 = vector.shape_cast %26 : vector<1x128x128xbf16> to vector<128x128xbf16>
    %cst_11 = arith.constant dense<0.000000e+00> : vector<8x128xf32>
    %28 = tpu.matmul %24, %27, %cst_11 {dimension_numbers = #tpu.dot_dimension_numbers<[1], [0], [0], [1], [0, 0, 1, 1], [], []>} : vector<8x128xbf16>, vector<128x128xbf16>, vector<8x128xf32> -> vector<8x128xf32>
    %29 = arith.index_cast %c1_i32 : i32 to index
    %c0_12 = arith.constant 0 : index
    %c0_13 = arith.constant 0 : index
    %30 = vector.load %arg3[%29, %c0_12, %c0_13] : memref<3x1x128xf32, #tpu.memory_space<vmem>>, vector<1x1x128xf32>
    %31 = vector.shape_cast %30 : vector<1x1x128xf32> to vector<1x128xf32>
    %32 = vector.broadcast %31 : vector<1x128xf32> to vector<8x128xf32>
    %33 = arith.addf %28, %32 : vector<8x128xf32>
    %34 = arith.mulf %33, %33 : vector<8x128xf32>
    %35 = arith.mulf %33, %34 : vector<8x128xf32>
    %cst_14 = arith.constant 4.471500e-02 : f32
    %36 = vector.broadcast %cst_14 : f32 to vector<8x128xf32>
    %37 = arith.mulf %36, %35 : vector<8x128xf32>
    %38 = arith.addf %33, %37 : vector<8x128xf32>
    %cst_15 = arith.constant 0.797884583 : f32
    %39 = vector.broadcast %cst_15 : f32 to vector<8x128xf32>
    %40 = arith.mulf %39, %38 : vector<8x128xf32>
    %41 = math.tanh %40 : vector<8x128xf32>
    %cst_16 = arith.constant 1.000000e+00 : f32
    %42 = vector.broadcast %cst_16 : f32 to vector<8x128xf32>
    %43 = arith.addf %42, %41 : vector<8x128xf32>
    %cst_17 = arith.constant 5.000000e-01 : f32
    %44 = vector.broadcast %cst_17 : f32 to vector<8x128xf32>
    %45 = arith.mulf %44, %43 : vector<8x128xf32>
    %46 = arith.mulf %33, %45 : vector<8x128xf32>
    %47 = arith.truncf %46 : vector<8x128xf32> to vector<8x128xbf16>
    %c2_i32 = arith.constant 2 : i32
    %48 = arith.index_cast %c2_i32 : i32 to index
    %c0_18 = arith.constant 0 : index
    %c0_19 = arith.constant 0 : index
    %49 = vector.load %arg2[%48, %c0_18, %c0_19] : memref<3x128x128xbf16, #tpu.memory_space<vmem>>, vector<1x128x128xbf16>
    %50 = vector.shape_cast %49 : vector<1x128x128xbf16> to vector<128x128xbf16>
    %cst_20 = arith.constant dense<0.000000e+00> : vector<8x128xf32>
    %51 = tpu.matmul %47, %50, %cst_20 {dimension_numbers = #tpu.dot_dimension_numbers<[1], [0], [0], [1], [0, 0, 1, 1], [], []>} : vector<8x128xbf16>, vector<128x128xbf16>, vector<8x128xf32> -> vector<8x128xf32>
    %52 = arith.index_cast %c2_i32 : i32 to index
    %c0_21 = arith.constant 0 : index
    %c0_22 = arith.constant 0 : index
    %53 = vector.load %arg3[%52, %c0_21, %c0_22] : memref<3x1x128xf32, #tpu.memory_space<vmem>>, vector<1x1x128xf32>
    %54 = vector.shape_cast %53 : vector<1x1x128xf32> to vector<1x128xf32>
    %55 = vector.broadcast %54 : vector<1x128xf32> to vector<8x128xf32>
    %56 = arith.addf %51, %55 : vector<8x128xf32>
    %57 = arith.mulf %56, %56 : vector<8x128xf32>
    %58 = arith.mulf %56, %57 : vector<8x128xf32>
    %cst_23 = arith.constant 4.471500e-02 : f32
    %59 = vector.broadcast %cst_23 : f32 to vector<8x128xf32>
    %60 = arith.mulf %59, %58 : vector<8x128xf32>
    %61 = arith.addf %56, %60 : vector<8x128xf32>
    %cst_24 = arith.constant 0.797884583 : f32
    %62 = vector.broadcast %cst_24 : f32 to vector<8x128xf32>
    %63 = arith.mulf %62, %61 : vector<8x128xf32>
    %64 = math.tanh %63 : vector<8x128xf32>
    %cst_25 = arith.constant 1.000000e+00 : f32
    %65 = vector.broadcast %cst_25 : f32 to vector<8x128xf32>
    %66 = arith.addf %65, %64 : vector<8x128xf32>
    %cst_26 = arith.constant 5.000000e-01 : f32
    %67 = vector.broadcast %cst_26 : f32 to vector<8x128xf32>
    %68 = arith.mulf %67, %66 : vector<8x128xf32>
    %69 = arith.mulf %56, %68 : vector<8x128xf32>
    %70 = arith.truncf %69 : vector<8x128xf32> to vector<8x128xbf16>
    %c3_i32 = arith.constant 3 : i32
    %71 = arith.extf %70 : vector<8x128xbf16> to vector<8x128xf32>
    %c0_27 = arith.constant 0 : index
    %c0_28 = arith.constant 0 : index
    %72 = vector.load %arg4[%c0_27, %c0_28] : memref<8x128xf32, #tpu.memory_space<vmem>>, vector<8x128xf32>
    tpu.vector_store %arg4[%c0_27, %c0_28], %71 {strides = array<i32>} : memref<8x128xf32, #tpu.memory_space<vmem>>, vector<8x128xf32>,
    return
  }
  func.func @transform_0(%arg0: i32) -> (i32, i32) {
    %c0_i32 = arith.constant 0 : i32
    %c0_i32_0 = arith.constant 0 : i32
    return %arg0, %c0_i32 : i32, i32
  }
  func.func @transform_1(%arg0: i32) -> (i32, i32, i32) {
    %c0_i32 = arith.constant 0 : i32
    %c0_i32_0 = arith.constant 0 : i32
    %c0_i32_1 = arith.constant 0 : i32
    %c0_i32_2 = arith.constant 0 : i32
    return %c0_i32, %c0_i32_0, %c0_i32_1 : i32, i32, i32
  }
  func.func @transform_2(%arg0: i32) -> (i32, i32, i32) {
    %c0_i32 = arith.constant 0 : i32
    %c0_i32_0 = arith.constant 0 : i32
    %c0_i32_1 = arith.constant 0 : i32
    %c0_i32_2 = arith.constant 0 : i32
    return %c0_i32, %c0_i32_0, %c0_i32_1 : i32, i32, i32
  }
  func.func @transform_3(%arg0: i32) -> (i32, i32) {
    %c0_i32 = arith.constant 0 : i32
    %c0_i32_0 = arith.constant 0 : i32
    return %arg0, %c0_i32 : i32, i32
  }
}

</mosaic_0001>

<bundles_post_ra>
// kernel: tpu_custom_call.1
= control target key start
LH: loop header
LB: loop body
LE: loop exit
PB: predicated region body
PF: predicated region fallthrough
CT: control target
= control target key end

     0   :  { %8 = vsyncpa [#allocation3], 0  ;;  %s1287_s0 = inlined_call_operand.hbm [shape: f32[16,128], index: 0, kind: input, shape index: {}]   ;;  %s1288_s1 = inlined_call_operand.hbm [shape: bf16[3,128,128], index: 1, kind: input, shape index: {}]   ;;  %s1289_s2 = inlined_call_operand.vmem [shape: f32[3,1,128], index: 2, kind: input, shape index: {}]   ;;  %s1290_s3 = inlined_call_operand.hbm [shape: f32[16,128], index: 3, kind: output, shape index: {}]  }
   0x1   :  { %10 = vsyncpa [#allocation3 + $0x1], 0 }
   0x2   :  { %11 = vsyncpa [#allocation6], 0 }
   0x3   :  { %12 = vsyncpa [#allocation4], 0 }
   0x4   :  { %14 = vsyncpa [#allocation4 + $0x1], 0  ;;  %s1045_s12 = smov 0   ;;  %s1047_s13 = smov 0  }
   0x5   :  { %s1049_s14 = smov 0   ;;  %s1051_s15 = smov 0  }
   0x6 LB: > { %s1066_s16 = sadd.s32 4294967295, %s1016_s15   ;;  %s667_s17 = sadd.s32 4294967294, %s1016_s15   ;;  %s1016_s15 = sphi %s1051_s15, %s1310_s15   ;;  %s1012_s14 = sphi %s1049_s14, %s1309_s14   ;;  %s1008_s13 = sphi %s1047_s13, %s1308_s13   ;;  %s1004_s12 = sphi %s1045_s12, %s1307_s12  }
   0x7   : > { %p40_p0 = scmp.ne.s32.totalorder %s1008_s13, %s1004_s12  ;;  %p1291_p1 = scmp.eq.s32.totalorder %s1066_s16, 0 }
   0x8   : > { %p112_p3 = scmp.eq.s32.totalorder %s667_s17, 1  ;;  %p668_p5 = scmp.ge.s32.totalorder %s1016_s15, 1 }
   0x9   : > { %p1075_p4 = por %p1291_p1, %p40_p0  ;;  %p119_p7 = scmp.lt.s32.totalorder %s1016_s15, 3 }
   0xa   : > { %p1080_p6 = por %p112_p3, %p40_p0  ;;  %s1018_s21 = smov [#allocation5]  }
   0xb   : > { %s1294_s18 = scalar_select %p1075_p4, 1, 0 }
   0xc   : > { %s1295_s19 = scalar_select %p1080_p6, 1, 0 }
   0xd   : > { %p1085_p8 = pnand %p668_p5, %p119_p7  ;;  %s131_s22 = sshll.u32 %s1018_s21, 4  ;;  %s1089_s22 = int_to_ptr.vmem [resolvable:$true] %s131_s22 }
   0xe   : > { %s1101_s24 = sadd.s32 1, %s1016_s15   ;;  %s27_s25 = sadd.s32 1, %s1012_s14 }
   0xf   : > { %s1296_s20 = scalar_select %p1085_p8, 1, 0 }
  0x10   : > { %p805_p9 = pneg %p1085_p8  ;;  %s24_s26 = ssub.s32 %s1016_s15, %s1101_s24 }
  0x11   : > { %s888_s29 = scalar_lea.hbm %s1288_s1, 3072 }
  0x12   : > { %p1096_p11 = pnand %p805_p9, %p1291_p1  ;;  %p889_p12 = scmp.ne.s32.totalorder %s1288_s1, %s888_s29 }
  0x13   : > { %p895_p5 = scmp.lt.u32.totalorder %s888_s29, %s1288_s1 }
  0x14   : > { %p890_p13 = pneg %p1096_p11 }
  0x16   : > { %p891_p0 = pnand %p890_p13, %p889_p12 }
  0x18   : > { %p892_p3 = pneg %p891_p0 }
  0x1a   : > { %p897_p7 = pnand %p895_p5, %p892_p3 }
  0x1c   : > { %900 = shalt.err (!%p897_p7)
}
  0x1d   : > { %s901_s7 = scalar_lea.vmem %s1089_s22, 3072  ;;  %p909_p2 = scmp.lt.s32.totalorder %s1089_s22, %s1089_s22 }
  0x1e   : > { %p902_p9 = scmp.ne.s32.totalorder %s1089_s22, %s901_s7  ;;  %p910_p6 = scmp.lt.s32.totalorder %s901_s7, %s901_s7 }
  0x20   : > { %p904_p10 = pnand %p902_p9, %p890_p13  ;;  %p911_p4 = por %p910_p6, %p909_p2 }
  0x22   : > { %p905_p1 = pneg %p904_p10 }
  0x24   : > { %p912_p8 = pnand %p911_p4, %p905_p1 }
  0x26   : > { %915 = shalt.err (!%p912_p8)
}
  0x27   : > { %s1019_s8 = smov 64   ;;  %s1020_s9 = smov 4  }
  0x28   : > { %808 = dma.hbm_to_vmem [thread:$0]  (!%p1096_p11), %s1288_s1, 3072, %s1089_s22, [#allocation6], %s1019_s8, %s1019_s8, %s1020_s9  }
  0x29   : > { %p25_p2 = scmp.eq.s32.totalorder %s24_s26, 0  ;;  %p34_p1 = scmp.ne.s32.totalorder %s1012_s14, %s1008_s13 }
  0x2a   : > { %p35_p4 = scmp.eq.s32.totalorder %s1016_s15, 0  ;;  %p818_p6 = scmp.lt.s32.totalorder %s1016_s15, 2 }
  0x2b   : > { %s1132_s17 = scalar_select %p25_p2, %s1012_s14, %s27_s25  }
  0x2c   : > { %p36_p8 = por %p35_p4, %p34_p1  ;;  %p1298_p10 = scmp.eq.s32.totalorder %s1066_s16, 1 }
  0x2d   : > { %s148_s27 = sand.u32 1, %s1012_s14   ;;  %s672_s28 = sshll.u32 %s1016_s15, 7 }
  0x2e   : > { %p1136_p12 = por %p1298_p10, %p34_p1  ;;  %s671_s29 = sshll.u32 %s148_s27, 3 }
  0x2f   : > { %s1145_s4 = scalar_lea.hbm %s1287_s0, %s672_s28  ;;  %s152_s22 = scalar_lea.vmem [#allocation2], %s671_s29 }
  0x30   : > { %s159_s25 = sshll.u32 %s152_s22, 4  ;;  %p1147_p11 = pnand %p818_p6, %p36_p8  ;;  %s1151_s25 = int_to_ptr.vmem [resolvable:$true] %s159_s25 }
  0x31   : > { %s149_s5 = scalar_lea.sflag [#allocation3], %s148_s27  ;;  %s916_s6 = scalar_lea.hbm %s1145_s4, 128 }
  0x32   : > { %p917_p13 = scmp.ne.s32.totalorder %s1145_s4, %s916_s6  ;;  %p918_p0 = pneg %p1147_p11 }
  0x33   : > { %s921_s9 = scalar_lea.hbm %s1287_s0, 256  ;;  %p922_p7 = scmp.lt.u32.totalorder %s1145_s4, %s1287_s0 }
  0x34   : > { %p919_p3 = pnand %p918_p0, %p917_p13  ;;  %p923_p9 = scmp.lt.u32.totalorder %s921_s9, %s916_s6 }
  0x35   : > { %p925_p1 = scmp.lt.u32.totalorder %s916_s6, %s1145_s4 }
  0x36   : > { %p920_p5 = pneg %p919_p3  ;;  %p924_p2 = por %p923_p9, %p922_p7 }
  0x38   : > { %p926_p4 = por %p925_p1, %p924_p2 }
  0x3a   : > { %p927_p6 = pnand %p926_p4, %p920_p5 }
  0x3c   : > { %930 = shalt.err (!%p927_p6)
}
  0x3d   : > { %s931_s27 = scalar_lea.vmem %s1151_s25, 128  ;;  %s1021_s28 = smov [#allocation2]  }
  0x3e   : > { %p932_p8 = scmp.ne.s32.totalorder %s1151_s25, %s931_s27  ;;  %s936_s29 = sshll.u32 %s1021_s28, 4  ;;  %s937_s29 = int_to_ptr.vmem [resolvable:$false] %s936_s29 }
  0x3f   : > { %s938_s23 = scalar_lea.vmem %s937_s29, 256  ;;  %p939_p3 = scmp.lt.s32.totalorder %s1151_s25, %s937_s29 }
  0x40   : > { %p934_p10 = pnand %p932_p8, %p918_p0  ;;  %p940_p7 = scmp.lt.s32.totalorder %s938_s23, %s931_s27 }
  0x42   : > { %p935_p13 = pneg %p934_p10  ;;  %p941_p9 = por %p940_p7, %p939_p3 }
  0x44   : > { %p942_p2 = pnand %p941_p9, %p935_p13 }
  0x46   : > { %945 = shalt.err (!%p942_p2)
}
  0x47   : > { %812 = dma.hbm_to_vmem [thread:$0]  (!%p1147_p11), %s1145_s4, 128, %s1151_s25, %s149_s5  }
  0x48   : > { %p1301_p5 = scmp.ne.s32.totalorder %s1296_s20, 0 }
  0x49   : > { %s1181_s30 = sand.u32 (!%p1301_p5), 1, %s1008_s13   ;;  %p1302_p0 = scmp.ne.s32.totalorder (!%p1301_p5), %s1294_s18, 0 }
  0x4a   : > { %168 = sbr.rel (%p1301_p5) target bundleno = 864 (0x360), region = 32  ;;  %s674_s22 = sshll.u32 (!%p1301_p5), %s1181_s30, 3 }
  0x4b   : > { %s171_s6 = scalar_lea.sflag (!%p1301_p5), [#allocation3], %s1181_s30  ;;  %s1187_s7 = scalar_lea.vmem (!%p1301_p5), [#allocation2], %s674_s22 }
  0x51   : > { %991 = dma.done.wait (%p1302_p0), %s171_s6, 128  }
  0x52   : > { %993 = vsyncadd (%p1302_p0), %s171_s6, 4294967168  ;;  %p1303_p11 = scmp.eq.s32.totalorder %s1066_s16, 0 }
  0x54   : > { %995 = dma.done.wait (%p1303_p11), [#allocation6], 3072   ;;  %p1304_p1 = pmov %p1303_p11 }
  0x55   : > { %v1022_v0 = vmov 0.0   ;;  %vm1023_vm0 = vmmov 0   ;;  %v858_v1 = vld [vmem:[#allocation5] sm:$0xff]   ;;  %v859_v2 = vld [vmem:[#allocation5 + $0x8] sm:$0xff]   ;;  %v860_v3 = vld [vmem:[#allocation5 + $0x10] sm:$0xff]   ;;  %s707_s8 = sshll.u32 %s1066_s16, 7 }
  0x56   : > { %997 = vsyncadd (%p1304_p1), [#allocation6], 4294964224  ;;  %737 = vmatprep.subr.bf16.mxu0 %v1022_v0  ;;  %753 = vmatprep.mubr.msk.bf16.mxu0 %vm1023_vm0, %v1022_v0  ;;  %v861_v4 = vld [vmem:[#allocation5 + $0x18] sm:$0xff]   ;;  %v862_v5 = vld [vmem:[#allocation5 + $0x20] sm:$0xff]   ;;  %s200_s9 = scalar_lea.vmem [#allocation7], %s674_s22  ;;  %s1243_s28 = scalar_lea.hbm %s1290_s3, %s707_s8 }
  0x57   : > { %757 = vmatprep.subr.bf16.mxu1 %v1022_v0  ;;  %773 = vmatprep.mubr.msk.bf16.mxu1 %vm1023_vm0, %v1022_v0  ;;  %v863_v6 = vld [vmem:[#allocation5 + $0x28] sm:$0xff]   ;;  %v864_v7 = vld [vmem:[#allocation5 + $0x30] sm:$0xff]   ;;  %v865_v8 = vld [vmem:[#allocation5 + $0x38] sm:$0xff]   ;;  %s587_s10 = sshll.u32 %s200_s9, 4  ;;  %s574_s29 = scalar_lea.sflag [#allocation4], %s1181_s30  ;;  %s1245_s10 = int_to_ptr.vmem [resolvable:$true] %s587_s10 }
  0x58   : > { %738 = vmatpush3.bf16.msra.mxu0 %v858_v1  ;;  %v202_v9 = vld [vmem:[%s1187_s7] sm:$0xff]  ;;  %v866_v11 = vld [vmem:[#allocation5 + $0x40] sm:$0xff]   ;;  %v867_v12 = vld [vmem:[#allocation5 + $0x48] sm:$0xff]   ;;  %s946_s23 = scalar_lea.vmem %s1245_s10, 128  ;;  %s1024_s16 = smov [#allocation7]  }
  0x59   : > { %739 = vmatprep.subr.bf16.mxu0 %v1022_v0  ;;  %v203_v10 = vpack.c.bf16 %v202_v9, %v202_v9  ;;  %758 = vmatpush3.bf16.msra.mxu1 %v866_v11  ;;  %v868_v13 = vld [vmem:[#allocation5 + $0x50] sm:$0xff]   ;;  %v869_v14 = vld [vmem:[#allocation5 + $0x58] sm:$0xff]   ;;  %v870_v15 = vld [vmem:[#allocation5 + $0x60] sm:$0xff]   ;;  %p947_p4 = scmp.ne.s32.totalorder %s1245_s10, %s946_s23  ;;  %s950_s22 = sshll.u32 %s1024_s16, 4  ;;  %s951_s22 = int_to_ptr.vmem [resolvable:$false] %s950_s22 }
  0x5a   : > { %759 = vmatprep.subr.bf16.mxu1 %v1022_v0  ;;  %v871_v16 = vld [vmem:[#allocation5 + $0x68] sm:$0xff]   ;;  %v872_v17 = vld [vmem:[#allocation5 + $0x70] sm:$0xff]   ;;  %v873_v18 = vld [vmem:[#allocation5 + $0x78] sm:$0xff]   ;;  %s952_s6 = scalar_lea.vmem %s951_s22, 256  ;;  %p953_p10 = scmp.lt.s32.totalorder %s1245_s10, %s951_s22 }
  0x5b   : > { %v677_v19 = vld [vmem:[%s1289_s2] ss:$0 sm:$0xff]  ;;  %v874_v35 = vld [vmem:[#allocation5 + $0x80] sm:$0xff]   ;;  %v875_v36 = vld [vmem:[#allocation5 + $0x88] sm:$0xff]   ;;  %p948_p6 = pnand %p947_p4, %p1136_p12  ;;  %p954_p13 = scmp.lt.s32.totalorder %s952_s6, %s946_s23 }
  0x5c   : > { %740 = vmatpush3.bf16.msra.mxu0 %v859_v2  ;;  %v876_v37 = vld [vmem:[#allocation5 + $0x90] sm:$0xff]   ;;  %v877_v38 = vld [vmem:[#allocation5 + $0x98] sm:$0xff]   ;;  %v878_v39 = vld [vmem:[#allocation5 + $0xa0] sm:$0xff]  }
  0x5d   : > { %741 = vmatprep.subr.bf16.mxu0 %v1022_v0  ;;  %760 = vmatpush3.bf16.msra.mxu1 %v867_v12  ;;  %v879_v40 = vld [vmem:[#allocation5 + $0xa8] sm:$0xff]   ;;  %v880_v41 = vld [vmem:[#allocation5 + $0xb0] sm:$0xff]   ;;  %v881_v42 = vld [vmem:[#allocation5 + $0xb8] sm:$0xff]   ;;  %p949_p8 = pneg %p948_p6  ;;  %p955_p3 = por %p954_p13, %p953_p10 }
  0x5e   : > { %761 = vmatprep.subr.bf16.mxu1 %v1022_v0  ;;  %v687_v43 = vld [vmem:[%s1289_s2 + $0x1] ss:$0 sm:$0xff]  ;;  %v697_v59 = vld [vmem:[%s1289_s2 + $0x2] ss:$0 sm:$0xff] }
  0x5f   : > { %p956_p7 = pnand %p955_p3, %p949_p8 }
  0x60   : > { %742 = vmatpush3.bf16.msra.mxu0 %v860_v3 }
  0x61   : > { %743 = vmatprep.subr.bf16.mxu0 %v1022_v0  ;;  %762 = vmatpush3.bf16.msra.mxu1 %v868_v13 }
  0x62   : > { %763 = vmatprep.subr.bf16.mxu1 %v1022_v0 }
  0x64   : > { %744 = vmatpush3.bf16.msra.mxu0 %v861_v4 }
  0x65   : > { %745 = vmatprep.subr.bf16.mxu0 %v1022_v0  ;;  %764 = vmatpush3.bf16.msra.mxu1 %v869_v14 }
  0x66   : > { %765 = vmatprep.subr.bf16.mxu1 %v1022_v0 }
  0x68   : > { %746 = vmatpush3.bf16.msra.mxu0 %v862_v5 }
  0x69   : > { %747 = vmatprep.subr.bf16.mxu0 %v1022_v0  ;;  %766 = vmatpush3.bf16.msra.mxu1 %v870_v15 }
  0x6a   : > { %767 = vmatprep.subr.bf16.mxu1 %v1022_v0 }
  0x6c   : > { %748 = vmatpush3.bf16.msra.mxu0 %v863_v6 }
  0x6d   : > { %749 = vmatprep.subr.bf16.mxu0 %v1022_v0  ;;  %768 = vmatpush3.bf16.msra.mxu1 %v871_v16 }
  0x6e   : > { %769 = vmatprep.subr.bf16.mxu1 %v1022_v0 }
  0x70   : > { %750 = vmatpush3.bf16.msra.mxu0 %v864_v7 }
  0x71   : > { %751 = vmatprep.subr.bf16.mxu0 %v1022_v0  ;;  %770 = vmatpush3.bf16.msra.mxu1 %v872_v17 }
  0x72   : > { %771 = vmatprep.subr.bf16.mxu1 %v1022_v0 }
  0x74   : > { %752 = vmatpush3.bf16.msra.mxu0 %v865_v8 }
  0x75   : > { %777 = vmatprep.subr.bf16.mxu0 %v1022_v0  ;;  %772 = vmatpush3.bf16.msra.mxu1 %v873_v18 }
  0x77   : > { %754 = vmatmul.mubr.bf16.vlgmr.msra.gmra.mrb[0].mxu0 %v203_v10 }
  0x78   : > { %793 = vmatprep.mubr.msk.bf16.mxu0 %vm1023_vm0, %v1022_v0  ;;  %778 = vmatpush3.bf16.msra.mxu0 %v874_v35 }
  0x79   : > { %779 = vmatprep.subr.bf16.mxu0 %v1022_v0 }
  0x7c   : > { %780 = vmatpush3.bf16.msra.mxu0 %v875_v36 }
  0x7d   : > { %781 = vmatprep.subr.bf16.mxu0 %v1022_v0 }
  0x80   : > { %782 = vmatpush3.bf16.msra.mxu0 %v876_v37 }
  0x81   : > { %783 = vmatprep.subr.bf16.mxu0 %v1022_v0 }
  0x84   : > { %784 = vmatpush3.bf16.msra.mxu0 %v877_v38 }
  0x85   : > { %785 = vmatprep.subr.bf16.mxu0 %v1022_v0 }
  0x88   : > { %786 = vmatpush3.bf16.msra.mxu0 %v878_v39 }
  0x89   : > { %787 = vmatprep.subr.bf16.mxu0 %v1022_v0 }
  0x8c   : > { %788 = vmatpush3.bf16.msra.mxu0 %v879_v40 }
  0x8d   : > { %789 = vmatprep.subr.bf16.mxu0 %v1022_v0 }
  0x90   : > { %790 = vmatpush3.bf16.msra.mxu0 %v880_v41 }
  0x91   : > { %791 = vmatprep.subr.bf16.mxu0 %v1022_v0 }
  0x94   : > { %792 = vmatpush3.bf16.msra.mxu0 %v881_v42 }
 0x14a   : > { %v309_v20 = vpop.f32.mrb[0].mxu0 }
 0x14b   : > { %v310_v21 = vadd.f32 %v677_v19, %v309_v20  ;;  %v755_v22 = vpop.f32.mrb[1].mxu0 }
 0x14c   : > { %v312_v23 = vpop.f32.mrb[2].mxu0 }
 0x14d   : > { %v315_v24 = vmul.f32 %v310_v21, %v310_v21  ;;  %v756_v25 = vpop.f32.mrb[3].mxu0 }
 0x14f   : > { %v316_v26 = vmul.f32 %v315_v24, %v310_v21 }
 0x151   : > { %v317_v27 = vmul.f32 0.044715, %v316_v26 }
 0x153   : > { %v318_v28 = vadd.f32 %v317_v27, %v310_v21 }
 0x155   : > { %v319_v29 = vmul.f32 0.7978846, %v318_v28 }
 0x157   : > { %882 = vtanh.f32 %v319_v29 }
 0x161   : > { %v883_v30 = vpop.eup %882 }
 0x162   : > { %v321_v31 = vadd.f32 1.0, %v883_v30 }
 0x164   : > { %v322_v32 = vmul.f32 0.5, %v321_v31 }
 0x166   : > { %v323_v33 = vmul.f32 %v322_v32, %v310_v21 }
 0x168   : > { %v324_v34 = vpack.c.bf16 %v323_v33, %v323_v33 }
 0x16a   : > { %774 = vmatmul.mubr.bf16.vlgmr.msra.gmra.mrb[0].mxu1 %v324_v34 }
 0x23d   : > { %v432_v44 = vpop.f32.mrb[0].mxu1 }
 0x23e   : > { %v433_v45 = vadd.f32 %v687_v43, %v432_v44  ;;  %v775_v46 = vpop.f32.mrb[1].mxu1 }
 0x23f   : > { %v435_v47 = vpop.f32.mrb[2].mxu1 }
 0x240   : > { %v438_v48 = vmul.f32 %v433_v45, %v433_v45  ;;  %v776_v49 = vpop.f32.mrb[3].mxu1 }
 0x242   : > { %v439_v50 = vmul.f32 %v438_v48, %v433_v45 }
 0x244   : > { %v440_v51 = vmul.f32 0.044715, %v439_v50 }
 0x246   : > { %v441_v52 = vadd.f32 %v440_v51, %v433_v45 }
 0x248   : > { %v442_v53 = vmul.f32 0.7978846, %v441_v52 }
 0x24a   : > { %884 = vtanh.f32 %v442_v53 }
 0x254   : > { %v885_v54 = vpop.eup %884 }
 0x255   : > { %v444_v55 = vadd.f32 1.0, %v885_v54 }
 0x257   : > { %v445_v56 = vmul.f32 0.5, %v444_v55 }
 0x259   : > { %v446_v57 = vmul.f32 %v445_v56, %v433_v45 }
 0x25b   : > { %v447_v58 = vpack.c.bf16 %v446_v57, %v446_v57 }
 0x25d   : > { %794 = vmatmul.mubr.bf16.vlgmr.msra.gmra.mrb[4].mxu0 %v447_v58 }
 0x330   : > { %v555_v60 = vpop.f32.mrb[4].mxu0 }
 0x331   : > { %v556_v61 = vadd.f32 %v697_v59, %v555_v60  ;;  %v795_v62 = vpop.f32.mrb[5].mxu0 }
 0x332   : > { %v558_v63 = vpop.f32.mrb[6].mxu0 }
 0x333   : > { %v561_v0 = vmul.f32 %v556_v61, %v556_v61  ;;  %v796_v1 = vpop.f32.mrb[7].mxu0 }
 0x335   : > { %v562_v2 = vmul.f32 %v561_v0, %v556_v61 }
 0x337   : > { %v563_v3 = vmul.f32 0.044715, %v562_v2 }
 0x339   : > { %v564_v4 = vadd.f32 %v563_v3, %v556_v61 }
 0x33b   : > { %v565_v5 = vmul.f32 0.7978846, %v564_v4 }
 0x33d   : > { %886 = vtanh.f32 %v565_v5 }
 0x347   : > { %v887_v6 = vpop.eup %886 }
 0x348   : > { %v567_v7 = vadd.f32 1.0, %v887_v6 }
 0x34a   : > { %v568_v8 = vmul.f32 0.5, %v567_v7 }
 0x34c   : > { %v569_v9 = vmul.f32 %v568_v8, %v556_v61 }
 0x34e   : > { %v570_v10 = vpack.c.bf16 %v569_v9, %v569_v9 }
 0x350   : > { %v571_v11 = vunpack.c.l.bf16 %v570_v10 }
 0x352   : > { %572 = vst [vmem:[%s200_s9] sm:$0xff] %v571_v11 }
 0x353   : > { %959 = shalt.err (!%p956_p7)
}
 0x354   : > { %s960_s30 = scalar_lea.hbm %s1243_s28, 128  ;;  %s964_s20 = scalar_lea.hbm %s1290_s3, 256 }
 0x355   : > { %p961_p9 = scmp.ne.s32.totalorder %s1243_s28, %s960_s30  ;;  %p965_p0 = scmp.lt.u32.totalorder %s1243_s28, %s1290_s3 }
 0x356   : > { %p966_p11 = scmp.lt.u32.totalorder %s964_s20, %s960_s30  ;;  %p968_p4 = scmp.lt.u32.totalorder %s960_s30, %s1243_s28 }
 0x357   : > { %p962_p2 = pnand %p961_p9, %p1136_p12 }
 0x358   : > { %p967_p1 = por %p966_p11, %p965_p0 }
 0x359   : > { %p963_p5 = pneg %p962_p2 }
 0x35a   : > { %p969_p6 = por %p968_p4, %p967_p1 }
 0x35c   : > { %p970_p8 = pnand %p969_p6, %p963_p5 }
 0x35e   : > { %973 = shalt.err (!%p970_p8)
}
 0x35f   : > { %803 = dma.vmem_to_hbm [thread:$0]  (%p1136_p12), %s1245_s10, 128, %s1243_s28, %s574_s29  }
 0x360 PF: > { %s599_s26 = sand.u32 1, %s1004_s12   ;;  %p1305_p10 = scmp.ne.s32.totalorder %s1295_s19, 0 }
 0x361   : > { %p1306_p13 = scmp.ge.s32.totalorder %s1016_s15, 2  ;;  %s600_s5 = scalar_lea.sflag [#allocation4], %s599_s26 }
 0x363   : > { %p814_p3 = pnand %p1306_p13, %p1305_p10 }
 0x365   : > { %999 = dma.done.wait (!%p814_p3), %s600_s5, 128  }
 0x366   : > { %1001 = vsyncadd (!%p814_p3), %s600_s5, 4294967168  ;;  %p17_p7 = scmp.ge.s32.totalorder %s1101_s24, 4   ;;  %s1307_s12 = smov %s1008_s13 }
 0x367   : > { %s1308_s13 = smov %s1012_s14  ;;  %s1309_s14 = smov %s1132_s17 }
 0x368   : > { %s1310_s15 = smov %s1101_s24  ;;  %19 = sbr.rel (!%p17_p7) target bundleno = 6 (0x6), region = 85 }
 0x36f   :  { %605 = vsyncpa [#allocation3], 1 }
 0x370   :  { %607 = vsyncpa [#allocation3 + $0x1], 1 }
 0x371   :  { %608 = vsyncpa [#allocation6], 1 }
 0x372   :  { %609 = vsyncpa [#allocation4], 1 }
 0x373   :  { %611 = vsyncpa [#allocation4 + $0x1], 1 }

// kernel: tpu_custom_call.1
= control target key start
LH: loop header
LB: loop body
LE: loop exit
PB: predicated region body
PF: predicated region fallthrough
CT: control target
= control target key end

     0   :  { %8 = vsyncpa [#allocation3], 0  ;;  %s1287_s0 = inlined_call_operand.hbm [shape: f32[16,128], index: 0, kind: input, shape index: {}]   ;;  %s1288_s1 = inlined_call_operand.hbm [shape: bf16[3,128,128], index: 1, kind: input, shape index: {}]   ;;  %s1289_s2 = inlined_call_operand.vmem [shape: f32[3,1,128], index: 2, kind: input, shape index: {}]   ;;  %s1290_s3 = inlined_call_operand.hbm [shape: f32[16,128], index: 3, kind: output, shape index: {}]  }
   0x1   :  { %10 = vsyncpa [#allocation3 + $0x1], 0 }
   0x2   :  { %11 = vsyncpa [#allocation6], 0 }
   0x3   :  { %12 = vsyncpa [#allocation4], 0 }
   0x4   :  { %14 = vsyncpa [#allocation4 + $0x1], 0  ;;  %s1045_s12 = smov 0   ;;  %s1047_s13 = smov 0  }
   0x5   :  { %s1049_s14 = smov 0   ;;  %s1051_s15 = smov 0  }
   0x6 LB: > { %s1066_s16 = sadd.s32 4294967295, %s1016_s15   ;;  %s667_s17 = sadd.s32 4294967294, %s1016_s15   ;;  %s1016_s15 = sphi %s1051_s15, %s1310_s15   ;;  %s1012_s14 = sphi %s1049_s14, %s1309_s14   ;;  %s1008_s13 = sphi %s1047_s13, %s1308_s13   ;;  %s1004_s12 = sphi %s1045_s12, %s1307_s12  }
   0x7   : > { %p40_p0 = scmp.ne.s32.totalorder %s1008_s13, %s1004_s12  ;;  %p1291_p1 = scmp.eq.s32.totalorder %s1066_s16, 0 }
   0x8   : > { %p112_p3 = scmp.eq.s32.totalorder %s667_s17, 1  ;;  %p668_p5 = scmp.ge.s32.totalorder %s1016_s15, 1 }
   0x9   : > { %p1075_p4 = por %p1291_p1, %p40_p0  ;;  %p119_p7 = scmp.lt.s32.totalorder %s1016_s15, 3 }
   0xa   : > { %p1080_p6 = por %p112_p3, %p40_p0  ;;  %s1018_s21 = smov [#allocation5]  }
   0xb   : > { %s1294_s18 = scalar_select %p1075_p4, 1, 0 }
   0xc   : > { %s1295_s19 = scalar_select %p1080_p6, 1, 0 }
   0xd   : > { %p1085_p8 = pnand %p668_p5, %p119_p7  ;;  %s131_s22 = sshll.u32 %s1018_s21, 4  ;;  %s1089_s22 = int_to_ptr.vmem [resolvable:$true] %s131_s22 }
   0xe   : > { %s1101_s24 = sadd.s32 1, %s1016_s15   ;;  %s27_s25 = sadd.s32 1, %s1012_s14 }
   0xf   : > { %s1296_s20 = scalar_select %p1085_p8, 1, 0 }
  0x10   : > { %p805_p9 = pneg %p1085_p8  ;;  %s24_s26 = ssub.s32 %s1016_s15, %s1101_s24 }
  0x11   : > { %s888_s29 = scalar_lea.hbm %s1288_s1, 3072 }
  0x12   : > { %p1096_p11 = pnand %p805_p9, %p1291_p1  ;;  %p889_p12 = scmp.ne.s32.totalorder %s1288_s1, %s888_s29 }
  0x13   : > { %p895_p5 = scmp.lt.u32.totalorder %s888_s29, %s1288_s1 }
  0x14   : > { %p890_p13 = pneg %p1096_p11 }
  0x16   : > { %p891_p0 = pnand %p890_p13, %p889_p12 }
  0x18   : > { %p892_p3 = pneg %p891_p0 }
  0x1a   : > { %p897_p7 = pnand %p895_p5, %p892_p3 }
  0x1c   : > { %900 = shalt.err (!%p897_p7)
}
  0x1d   : > { %s901_s7 = scalar_lea.vmem %s1089_s22, 3072  ;;  %p909_p2 = scmp.lt.s32.totalorder %s1089_s22, %s1089_s22 }
  0x1e   : > { %p902_p9 = scmp.ne.s32.totalorder %s1089_s22, %s901_s7  ;;  %p910_p6 = scmp.lt.s32.totalorder %s901_s7, %s901_s7 }
  0x20   : > { %p904_p10 = pnand %p902_p9, %p890_p13  ;;  %p911_p4 = por %p910_p6, %p909_p2 }
  0x22   : > { %p905_p1 = pneg %p904_p10 }
  0x24   : > { %p912_p8 = pnand %p911_p4, %p905_p1 }
  0x26   : > { %915 = shalt.err (!%p912_p8)
}
  0x27   : > { %s1019_s8 = smov 64   ;;  %s1020_s9 = smov 4  }
  0x28   : > { %808 = dma.hbm_to_vmem [thread:$0]  (!%p1096_p11), %s1288_s1, 3072, %s1089_s22, [#allocation6], %s1019_s8, %s1019_s8, %s1020_s9  }
  0x29   : > { %p25_p2 = scmp.eq.s32.totalorder %s24_s26, 0  ;;  %p34_p1 = scmp.ne.s32.totalorder %s1012_s14, %s1008_s13 }
  0x2a   : > { %p35_p4 = scmp.eq.s32.totalorder %s1016_s15, 0  ;;  %p818_p6 = scmp.lt.s32.totalorder %s1016_s15, 2 }
  0x2b   : > { %s1132_s17 = scalar_select %p25_p2, %s1012_s14, %s27_s25  }
  0x2c   : > { %p36_p8 = por %p35_p4, %p34_p1  ;;  %p1298_p10 = scmp.eq.s32.totalorder %s1066_s16, 1 }
  0x2d   : > { %s148_s27 = sand.u32 1, %s1012_s14   ;;  %s672_s28 = sshll.u32 %s1016_s15, 7 }
  0x2e   : > { %p1136_p12 = por %p1298_p10, %p34_p1  ;;  %s671_s29 = sshll.u32 %s148_s27, 3 }
  0x2f   : > { %s1145_s4 = scalar_lea.hbm %s1287_s0, %s672_s28  ;;  %s152_s22 = scalar_lea.vmem [#allocation2], %s671_s29 }
  0x30   : > { %s159_s25 = sshll.u32 %s152_s22, 4  ;;  %p1147_p11 = pnand %p818_p6, %p36_p8  ;;  %s1151_s25 = int_to_ptr.vmem [resolvable:$true] %s159_s25 }
  0x31   : > { %s149_s5 = scalar_lea.sflag [#allocation3], %s148_s27  ;;  %s916_s6 = scalar_lea.hbm %s1145_s4, 128 }
  0x32   : > { %p917_p13 = scmp.ne.s32.totalorder %s1145_s4, %s916_s6  ;;  %p918_p0 = pneg %p1147_p11 }
  0x33   : > { %s921_s9 = scalar_lea.hbm %s1287_s0, 256  ;;  %p922_p7 = scmp.lt.u32.totalorder %s1145_s4, %s1287_s0 }
  0x34   : > { %p919_p3 = pnand %p918_p0, %p917_p13  ;;  %p923_p9 = scmp.lt.u32.totalorder %s921_s9, %s916_s6 }
  0x35   : > { %p925_p1 = scmp.lt.u32.totalorder %s916_s6, %s1145_s4 }
  0x36   : > { %p920_p5 = pneg %p919_p3  ;;  %p924_p2 = por %p923_p9, %p922_p7 }
  0x38   : > { %p926_p4 = por %p925_p1, %p924_p2 }
  0x3a   : > { %p927_p6 = pnand %p926_p4, %p920_p5 }
  0x3c   : > { %930 = shalt.err (!%p927_p6)
}
  0x3d   : > { %s931_s27 = scalar_lea.vmem %s1151_s25, 128  ;;  %s1021_s28 = smov [#allocation2]  }
  0x3e   : > { %p932_p8 = scmp.ne.s32.totalorder %s1151_s25, %s931_s27  ;;  %s936_s29 = sshll.u32 %s1021_s28, 4  ;;  %s937_s29 = int_to_ptr.vmem [resolvable:$false] %s936_s29 }
  0x3f   : > { %s938_s23 = scalar_lea.vmem %s937_s29, 256  ;;  %p939_p3 = scmp.lt.s32.totalorder %s1151_s25, %s937_s29 }
  0x40   : > { %p934_p10 = pnand %p932_p8, %p918_p0  ;;  %p940_p7 = scmp.lt.s32.totalorder %s938_s23, %s931_s27 }
  0x42   : > { %p935_p13 = pneg %p934_p10  ;;  %p941_p9 = por %p940_p7, %p939_p3 }
  0x44   : > { %p942_p2 = pnand %p941_p9, %p935_p13 }
  0x46   : > { %945 = shalt.err (!%p942_p2)
}
  0x47   : > { %812 = dma.hbm_to_vmem [thread:$0]  (!%p1147_p11), %s1145_s4, 128, %s1151_s25, %s149_s5  }
  0x48   : > { %p1301_p5 = scmp.ne.s32.totalorder %s1296_s20, 0 }
  0x49   : > { %s1181_s30 = sand.u32 (!%p1301_p5), 1, %s1008_s13   ;;  %p1302_p0 = scmp.ne.s32.totalorder (!%p1301_p5), %s1294_s18, 0 }
  0x4a   : > { %168 = sbr.rel (%p1301_p5) target bundleno = 864 (0x360), region = 32  ;;  %s674_s22 = sshll.u32 (!%p1301_p5), %s1181_s30, 3 }
  0x4b   : > { %s171_s6 = scalar_lea.sflag (!%p1301_p5), [#allocation3], %s1181_s30  ;;  %s1187_s7 = scalar_lea.vmem (!%p1301_p5), [#allocation2], %s674_s22 }
  0x51   : > { %991 = dma.done.wait (%p1302_p0), %s171_s6, 128  }
  0x52   : > { %993 = vsyncadd (%p1302_p0), %s171_s6, 4294967168  ;;  %p1303_p11 = scmp.eq.s32.totalorder %s1066_s16, 0 }
  0x54   : > { %995 = dma.done.wait (%p1303_p11), [#allocation6], 3072   ;;  %p1304_p1 = pmov %p1303_p11 }
  0x55   : > { %v1022_v0 = vmov 0.0   ;;  %vm1023_vm0 = vmmov 0   ;;  %v858_v1 = vld [vmem:[#allocation5] sm:$0xff]   ;;  %v859_v2 = vld [vmem:[#allocation5 + $0x8] sm:$0xff]   ;;  %v860_v3 = vld [vmem:[#allocation5 + $0x10] sm:$0xff]   ;;  %s707_s8 = sshll.u32 %s1066_s16, 7 }
  0x56   : > { %997 = vsyncadd (%p1304_p1), [#allocation6], 4294964224  ;;  %737 = vmatprep.subr.bf16.mxu0 %v1022_v0  ;;  %753 = vmatprep.mubr.msk.bf16.mxu0 %vm1023_vm0, %v1022_v0  ;;  %v861_v4 = vld [vmem:[#allocation5 + $0x18] sm:$0xff]   ;;  %v862_v5 = vld [vmem:[#allocation5 + $0x20] sm:$0xff]   ;;  %s200_s9 = scalar_lea.vmem [#allocation7], %s674_s22  ;;  %s1243_s28 = scalar_lea.hbm %s1290_s3, %s707_s8 }
  0x57   : > { %757 = vmatprep.subr.bf16.mxu1 %v1022_v0  ;;  %773 = vmatprep.mubr.msk.bf16.mxu1 %vm1023_vm0, %v1022_v0  ;;  %v863_v6 = vld [vmem:[#allocation5 + $0x28] sm:$0xff]   ;;  %v864_v7 = vld [vmem:[#allocation5 + $0x30] sm:$0xff]   ;;  %v865_v8 = vld [vmem:[#allocation5 + $0x38] sm:$0xff]   ;;  %s587_s10 = sshll.u32 %s200_s9, 4  ;;  %s574_s29 = scalar_lea.sflag [#allocation4], %s1181_s30  ;;  %s1245_s10 = int_to_ptr.vmem [resolvable:$true] %s587_s10 }
  0x58   : > { %738 = vmatpush3.bf16.msra.mxu0 %v858_v1  ;;  %v202_v9 = vld [vmem:[%s1187_s7] sm:$0xff]  ;;  %v866_v11 = vld [vmem:[#allocation5 + $0x40] sm:$0xff]   ;;  %v867_v12 = vld [vmem:[#allocation5 + $0x48] sm:$0xff]   ;;  %s946_s23 = scalar_lea.vmem %s1245_s10, 128  ;;  %s1024_s16 = smov [#allocation7]  }
  0x59   : > { %739 = vmatprep.subr.bf16.mxu0 %v1022_v0  ;;  %v203_v10 = vpack.c.bf16 %v202_v9, %v202_v9  ;;  %758 = vmatpush3.bf16.msra.mxu1 %v866_v11  ;;  %v868_v13 = vld [vmem:[#allocation5 + $0x50] sm:$0xff]   ;;  %v869_v14 = vld [vmem:[#allocation5 + $0x58] sm:$0xff]   ;;  %v870_v15 = vld [vmem:[#allocation5 + $0x60] sm:$0xff]   ;;  %p947_p4 = scmp.ne.s32.totalorder %s1245_s10, %s946_s23  ;;  %s950_s22 = sshll.u32 %s1024_s16, 4  ;;  %s951_s22 = int_to_ptr.vmem [resolvable:$false] %s950_s22 }
  0x5a   : > { %759 = vmatprep.subr.bf16.mxu1 %v1022_v0  ;;  %v871_v16 = vld [vmem:[#allocation5 + $0x68] sm:$0xff]   ;;  %v872_v17 = vld [vmem:[#allocation5 + $0x70] sm:$0xff]   ;;  %v873_v18 = vld [vmem:[#allocation5 + $0x78] sm:$0xff]   ;;  %s952_s6 = scalar_lea.vmem %s951_s22, 256  ;;  %p953_p10 = scmp.lt.s32.totalorder %s1245_s10, %s951_s22 }
  0x5b   : > { %v677_v19 = vld [vmem:[%s1289_s2] ss:$0 sm:$0xff]  ;;  %v874_v35 = vld [vmem:[#allocation5 + $0x80] sm:$0xff]   ;;  %v875_v36 = vld [vmem:[#allocation5 + $0x88] sm:$0xff]   ;;  %p948_p6 = pnand %p947_p4, %p1136_p12  ;;  %p954_p13 = scmp.lt.s32.totalorder %s952_s6, %s946_s23 }
  0x5c   : > { %740 = vmatpush3.bf16.msra.mxu0 %v859_v2  ;;  %v876_v37 = vld [vmem:[#allocation5 + $0x90] sm:$0xff]   ;;  %v877_v38 = vld [vmem:[#allocation5 + $0x98] sm:$0xff]   ;;  %v878_v39 = vld [vmem:[#allocation5 + $0xa0] sm:$0xff]  }
  0x5d   : > { %741 = vmatprep.subr.bf16.mxu0 %v1022_v0  ;;  %760 = vmatpush3.bf16.msra.mxu1 %v867_v12  ;;  %v879_v40 = vld [vmem:[#allocation5 + $0xa8] sm:$0xff]   ;;  %v880_v41 = vld [vmem:[#allocation5 + $0xb0] sm:$0xff]   ;;  %v881_v42 = vld [vmem:[#allocation5 + $0xb8] sm:$0xff]   ;;  %p949_p8 = pneg %p948_p6  ;;  %p955_p3 = por %p954_p13, %p953_p10 }
  0x5e   : > { %761 = vmatprep.subr.bf16.mxu1 %v1022_v0  ;;  %v687_v43 = vld [vmem:[%s1289_s2 + $0x1] ss:$0 sm:$0xff]  ;;  %v697_v59 = vld [vmem:[%s1289_s2 + $0x2] ss:$0 sm:$0xff] }
  0x5f   : > { %p956_p7 = pnand %p955_p3, %p949_p8 }
  0x60   : > { %742 = vmatpush3.bf16.msra.mxu0 %v860_v3 }
  0x61   : > { %743 = vmatprep.subr.bf16.mxu0 %v1022_v0  ;;  %762 = vmatpush3.bf16.msra.mxu1 %v868_v13 }
  0x62   : > { %763 = vmatprep.subr.bf16.mxu1 %v1022_v0 }
  0x64   : > { %744 = vmatpush3.bf16.msra.mxu0 %v861_v4 }
  0x65   : > { %745 = vmatprep.subr.bf16.mxu0 %v1022_v0  ;;  %764 = vmatpush3.bf16.msra.mxu1 %v869_v14 }
  0x66   : > { %765 = vmatprep.subr.bf16.mxu1 %v1022_v0 }
  0x68   : > { %746 = vmatpush3.bf16.msra.mxu0 %v862_v5 }
  0x69   : > { %747 = vmatprep.subr.bf16.mxu0 %v1022_v0  ;;  %766 = vmatpush3.bf16.msra.mxu1 %v870_v15 }
  0x6a   : > { %767 = vmatprep.subr.bf16.mxu1 %v1022_v0 }
  0x6c   : > { %748 = vmatpush3.bf16.msra.mxu0 %v863_v6 }
  0x6d   : > { %749 = vmatprep.subr.bf16.mxu0 %v1022_v0  ;;  %768 = vmatpush3.bf16.msra.mxu1 %v871_v16 }
  0x6e   : > { %769 = vmatprep.subr.bf16.mxu1 %v1022_v0 }
  0x70   : > { %750 = vmatpush3.bf16.msra.mxu0 %v864_v7 }
  0x71   : > { %751 = vmatprep.subr.bf16.mxu0 %v1022_v0  ;;  %770 = vmatpush3.bf16.msra.mxu1 %v872_v17 }
  0x72   : > { %771 = vmatprep.subr.bf16.mxu1 %v1022_v0 }
  0x74   : > { %752 = vmatpush3.bf16.msra.mxu0 %v865_v8 }
  0x75   : > { %777 = vmatprep.subr.bf16.mxu0 %v1022_v0  ;;  %772 = vmatpush3.bf16.msra.mxu1 %v873_v18 }
  0x77   : > { %754 = vmatmul.mubr.bf16.vlgmr.msra.gmra.mrb[0].mxu0 %v203_v10 }
  0x78   : > { %793 = vmatprep.mubr.msk.bf16.mxu0 %vm1023_vm0, %v1022_v0  ;;  %778 = vmatpush3.bf16.msra.mxu0 %v874_v35 }
  0x79   : > { %779 = vmatprep.subr.bf16.mxu0 %v1022_v0 }
  0x7c   : > { %780 = vmatpush3.bf16.msra.mxu0 %v875_v36 }
  0x7d   : > { %781 = vmatprep.subr.bf16.mxu0 %v1022_v0 }
  0x80   : > { %782 = vmatpush3.bf16.msra.mxu0 %v876_v37 }
  0x81   : > { %783 = vmatprep.subr.bf16.mxu0 %v1022_v0 }
  0x84   : > { %784 = vmatpush3.bf16.msra.mxu0 %v877_v38 }
  0x85   : > { %785 = vmatprep.subr.bf16.mxu0 %v1022_v0 }
  0x88   : > { %786 = vmatpush3.bf16.msra.mxu0 %v878_v39 }
  0x89   : > { %787 = vmatprep.subr.bf16.mxu0 %v1022_v0 }
  0x8c   : > { %788 = vmatpush3.bf16.msra.mxu0 %v879_v40 }
  0x8d   : > { %789 = vmatprep.subr.bf16.mxu0 %v1022_v0 }
  0x90   : > { %790 = vmatpush3.bf16.msra.mxu0 %v880_v41 }
  0x91   : > { %791 = vmatprep.subr.bf16.mxu0 %v1022_v0 }
  0x94   : > { %792 = vmatpush3.bf16.msra.mxu0 %v881_v42 }
 0x14a   : > { %v309_v20 = vpop.f32.mrb[0].mxu0 }
 0x14b   : > { %v310_v21 = vadd.f32 %v677_v19, %v309_v20  ;;  %v755_v22 = vpop.f32.mrb[1].mxu0 }
 0x14c   : > { %v312_v23 = vpop.f32.mrb[2].mxu0 }
 0x14d   : > { %v315_v24 = vmul.f32 %v310_v21, %v310_v21  ;;  %v756_v25 = vpop.f32.mrb[3].mxu0 }
 0x14f   : > { %v316_v26 = vmul.f32 %v315_v24, %v310_v21 }
 0x151   : > { %v317_v27 = vmul.f32 0.044715, %v316_v26 }
 0x153   : > { %v318_v28 = vadd.f32 %v317_v27, %v310_v21 }
 0x155   : > { %v319_v29 = vmul.f32 0.7978846, %v318_v28 }
 0x157   : > { %882 = vtanh.f32 %v319_v29 }
 0x161   : > { %v883_v30 = vpop.eup %882 }
 0x162   : > { %v321_v31 = vadd.f32 1.0, %v883_v30 }
 0x164   : > { %v322_v32 = vmul.f32 0.5, %v321_v31 }
 0x166   : > { %v323_v33 = vmul.f32 %v322_v32, %v310_v21 }
 0x168   : > { %v324_v34 = vpack.c.bf16 %v323_v33, %v323_v33 }
 0x16a   : > { %774 = vmatmul.mubr.bf16.vlgmr.msra.gmra.mrb[0].mxu1 %v324_v34 }
 0x23d   : > { %v432_v44 = vpop.f32.mrb[0].mxu1 }
 0x23e   : > { %v433_v45 = vadd.f32 %v687_v43, %v432_v44  ;;  %v775_v46 = vpop.f32.mrb[1].mxu1 }
 0x23f   : > { %v435_v47 = vpop.f32.mrb[2].mxu1 }
 0x240   : > { %v438_v48 = vmul.f32 %v433_v45, %v433_v45  ;;  %v776_v49 = vpop.f32.mrb[3].mxu1 }
 0x242   : > { %v439_v50 = vmul.f32 %v438_v48, %v433_v45 }
 0x244   : > { %v440_v51 = vmul.f32 0.044715, %v439_v50 }
 0x246   : > { %v441_v52 = vadd.f32 %v440_v51, %v433_v45 }
 0x248   : > { %v442_v53 = vmul.f32 0.7978846, %v441_v52 }
 0x24a   : > { %884 = vtanh.f32 %v442_v53 }
 0x254   : > { %v885_v54 = vpop.eup %884 }
 0x255   : > { %v444_v55 = vadd.f32 1.0, %v885_v54 }
 0x257   : > { %v445_v56 = vmul.f32 0.5, %v444_v55 }
 0x259   : > { %v446_v57 = vmul.f32 %v445_v56, %v433_v45 }
 0x25b   : > { %v447_v58 = vpack.c.bf16 %v446_v57, %v446_v57 }
 0x25d   : > { %794 = vmatmul.mubr.bf16.vlgmr.msra.gmra.mrb[4].mxu0 %v447_v58 }
 0x330   : > { %v555_v60 = vpop.f32.mrb[4].mxu0 }
 0x331   : > { %v556_v61 = vadd.f32 %v697_v59, %v555_v60  ;;  %v795_v62 = vpop.f32.mrb[5].mxu0 }
 0x332   : > { %v558_v63 = vpop.f32.mrb[6].mxu0 }
 0x333   : > { %v561_v0 = vmul.f32 %v556_v61, %v556_v61  ;;  %v796_v1 = vpop.f32.mrb[7].mxu0 }
 0x335   : > { %v562_v2 = vmul.f32 %v561_v0, %v556_v61 }
 0x337   : > { %v563_v3 = vmul.f32 0.044715, %v562_v2 }
 0x339   : > { %v564_v4 = vadd.f32 %v563_v3, %v556_v61 }
 0x33b   : > { %v565_v5 = vmul.f32 0.7978846, %v564_v4 }
 0x33d   : > { %886 = vtanh.f32 %v565_v5 }
 0x347   : > { %v887_v6 = vpop.eup %886 }
 0x348   : > { %v567_v7 = vadd.f32 1.0, %v887_v6 }
 0x34a   : > { %v568_v8 = vmul.f32 0.5, %v567_v7 }
 0x34c   : > { %v569_v9 = vmul.f32 %v568_v8, %v556_v61 }
 0x34e   : > { %v570_v10 = vpack.c.bf16 %v569_v9, %v569_v9 }
 0x350   : > { %v571_v11 = vunpack.c.l.bf16 %v570_v10 }
 0x352   : > { %572 = vst [vmem:[%s200_s9] sm:$0xff] %v571_v11 }
 0x353   : > { %959 = shalt.err (!%p956_p7)
}
 0x354   : > { %s960_s30 = scalar_lea.hbm %s1243_s28, 128  ;;  %s964_s20 = scalar_lea.hbm %s1290_s3, 256 }
 0x355   : > { %p961_p9 = scmp.ne.s32.totalorder %s1243_s28, %s960_s30  ;;  %p965_p0 = scmp.lt.u32.totalorder %s1243_s28, %s1290_s3 }
 0x356   : > { %p966_p11 = scmp.lt.u32.totalorder %s964_s20, %s960_s30  ;;  %p968_p4 = scmp.lt.u32.totalorder %s960_s30, %s1243_s28 }
 0x357   : > { %p962_p2 = pnand %p961_p9, %p1136_p12 }
 0x358   : > { %p967_p1 = por %p966_p11, %p965_p0 }
 0x359   : > { %p963_p5 = pneg %p962_p2 }
 0x35a   : > { %p969_p6 = por %p968_p4, %p967_p1 }
 0x35c   : > { %p970_p8 = pnand %p969_p6, %p963_p5 }
 0x35e   : > { %973 = shalt.err (!%p970_p8)
}
 0x35f   : > { %803 = dma.vmem_to_hbm [thread:$0]  (%p1136_p12), %s1245_s10, 128, %s1243_s28, %s574_s29  }
 0x360 PF: > { %s599_s26 = sand.u32 1, %s1004_s12   ;;  %p1305_p10 = scmp.ne.s32.totalorder %s1295_s19, 0 }
 0x361   : > { %p1306_p13 = scmp.ge.s32.totalorder %s1016_s15, 2  ;;  %s600_s5 = scalar_lea.sflag [#allocation4], %s599_s26 }
 0x363   : > { %p814_p3 = pnand %p1306_p13, %p1305_p10 }
 0x365   : > { %999 = dma.done.wait (!%p814_p3), %s600_s5, 128  }
 0x366   : > { %1001 = vsyncadd (!%p814_p3), %s600_s5, 4294967168  ;;  %p17_p7 = scmp.ge.s32.totalorder %s1101_s24, 4   ;;  %s1307_s12 = smov %s1008_s13 }
 0x367   : > { %s1308_s13 = smov %s1012_s14  ;;  %s1309_s14 = smov %s1132_s17 }
 0x368   : > { %s1310_s15 = smov %s1101_s24  ;;  %19 = sbr.rel (!%p17_p7) target bundleno = 6 (0x6), region = 85 }
 0x36f   :  { %605 = vsyncpa [#allocation3], 1 }
 0x370   :  { %607 = vsyncpa [#allocation3 + $0x1], 1 }
 0x371   :  { %608 = vsyncpa [#allocation6], 1 }
 0x372   :  { %609 = vsyncpa [#allocation4], 1 }
 0x373   :  { %611 = vsyncpa [#allocation4 + $0x1], 1 }

</bundles_post_ra>
